<compile_context>
chip_gen: v6e
topology: v6e:2x2x1
jax: 0.10.0
libtpu: 0.0.40
codegen_flags: <defaults>
</compile_context>

<pallas_src>
import functools

import jax
import jax.numpy as jnp
from jax.experimental import pallas as pl
from jax.experimental.pallas import tpu as pltpu


_INV_SQRT2 = 0.7071067811865476


def _gelu(x, approximate):
    if approximate:
        # tanh approximation: transcendental goes to the EUP slot (separate
        # VLIW slot), leaving the 4-wide VALU free on v6e/v7x.
        return jax.nn.gelu(x, approximate=True)
    # torch.nn.GELU default ("none"): 0.5 * x * (1 + erf(x / sqrt(2))).
    return 0.5 * x * (1.0 + jax.lax.erf(x * _INV_SQRT2))


# ----------------------------------------------------------------------------
# Kernels
# ----------------------------------------------------------------------------
def _make_resident_kernel(approximate):
    """Weights fully resident in VMEM; grid = (m_tiles,)."""
    def kernel(x_ref, w1_ref, b1_ref, w2_ref, b2_ref, o_ref):
        # x_ref: (TM, D_in)   w1_ref: (D_in, H)  b1_ref: (1, H)
        # w2_ref: (H, D_out)  b2_ref: (1, D_out) o_ref: (TM, D_out)
        h = jnp.dot(x_ref[...], w1_ref[...], preferred_element_type=jnp.float32)
        h = _gelu(h + b1_ref[...].astype(jnp.float32), approximate)
        # dropout(p=0.0) == identity
        y = jnp.dot(h.astype(w2_ref.dtype), w2_ref[...],
                    preferred_element_type=jnp.float32)
        o_ref[...] = (y + b2_ref[...].astype(jnp.float32)).astype(o_ref.dtype)
        # dropout(p=0.0) == identity
    return kernel


def _make_streaming_kernel(approximate):
    """Hidden dim streamed on the last ("arbitrary") grid axis."""
    def kernel(x_ref, w1_ref, b1_ref, w2_ref, b2_ref, o_ref, acc_ref):
        # grid = (m_tiles, h_tiles); axis 1 is the hidden-reduction axis.
        k = pl.program_id(1)

        @pl.when(k == 0)
        def _():
            acc_ref[...] = jnp.zeros_like(acc_ref)

        h = jnp.dot(x_ref[...], w1_ref[...], preferred_element_type=jnp.float32)
        h = _gelu(h + b1_ref[...].astype(jnp.float32), approximate)
        acc_ref[...] += jnp.dot(h.astype(w2_ref.dtype), w2_ref[...],
                                preferred_element_type=jnp.float32)

        @pl.when(k == pl.num_programs(1) - 1)
        def _():
            o_ref[...] = (acc_ref[...] + b2_ref[...].astype(jnp.float32)
                          ).astype(o_ref.dtype)
    return kernel


# ----------------------------------------------------------------------------
# Sizing helpers
# ----------------------------------------------------------------------------
def _round_up(x, m):
    return (x + m - 1) // m * m


def _tpu_defaults():
    """(per-core VMEM bytes, default M tile) with conservative fallbacks."""
    vmem_cap = 64 * 1024 * 1024        # v7x per-TC; safe lower bound
    tile_m = 512
    try:
        info = pltpu.get_tpu_info()
        vmem_cap = int(info.vmem_capacity_bytes)
        name = str(getattr(info, "chip_version", "")).lower()
        if "v6" in name:
            tile_m = 1024              # streaming break-even ~680 rows on v6e
        elif "v5" in name:
            tile_m = 384               # 197 TF/s MXU saturates earlier on v5e
    except Exception:                  # pragma: no cover - emulator / old jax
        pass
    return vmem_cap, tile_m


def _pick_m_tile(M, tile_m_max):
    if M >= tile_m_max:
        return tile_m_max
    # TODO(synk): for tiny/decode M the MXU row fill is poor; a d_out-tiled
    # small-M path would improve latency-critical shapes.
    return _round_up(M, 16)            # small problems: one (padded) block


def _pick_h_tile(hidden, tile_h_max):
    tile_h_max = max(128, (tile_h_max // 128) * 128)
    if hidden <= tile_h_max:
        return hidden                  # whole hidden dim in one tile
    for cand in range(tile_h_max, 127, -128):
        if hidden % cand == 0:         # exact divisor -> no garbage in reduction
            return cand
    # TODO(synk): masked partial-hidden-tile path for awkward hidden sizes;
    # this fallback keeps the whole hidden resident per k step.
    return hidden


# ----------------------------------------------------------------------------
# Forward
# ----------------------------------------------------------------------------
@functools.partial(jax.jit, static_argnames=(
    "tile_m", "tile_h", "compute_dtype", "out_dtype",
    "weights_resident", "gelu_approximate"))
def mlp_forward(x, w1, b1, w2, b2, *, tile_m=None, tile_h=1024,
                compute_dtype=jnp.bfloat16, out_dtype=None,
                weights_resident=None, gelu_approximate=False):
    """x: (B, N, d_in) -> (B, N, d_out). fc1 -> GELU -> fc2 fused in one kernel."""
    B, N, d_in = x.shape
    hidden = w1.shape[1]
    d_out = w2.shape[1]
    out_dtype = x.dtype if out_dtype is None else out_dtype

    M = B * N
    x2d = x.reshape(M, d_in)

    # Matmul operands in the MXU-native dtype. For best steady-state HBM
    # traffic, pass weights already stored in `compute_dtype` (casts become
    # no-ops). Biases stay f32 for the f32 epilogue.
    if compute_dtype is not None:
        x2d = x2d.astype(compute_dtype)
        w1 = w1.astype(compute_dtype)
        w2 = w2.astype(compute_dtype)

    vmem_cap, tm_default = _tpu_defaults()
    tm = _pick_m_tile(M, tm_default if tile_m is None else tile_m)
    m_tiles = pl.cdiv(M, tm)

    x_b = jnp.dtype(x2d.dtype).itemsize
    w_b = jnp.dtype(w1.dtype).itemsize
    b_b = jnp.dtype(b1.dtype).itemsize
    o_b = jnp.dtype(out_dtype).itemsize

    # Resident-weights budget: weights conservatively counted double-buffered
    # even though their block index never changes, plus double-buffered x/out
    # tiles.
    resident_est = (2 * (d_in * hidden + hidden * d_out) * w_b
                    + 2 * (hidden + d_out) * b_b
                    + 2 * tm * d_in * x_b
                    + 2 * tm * d_out * o_b)
    if weights_resident is None:
        weights_resident = resident_est <= int(0.75 * vmem_cap)

    if weights_resident:
        grid = (m_tiles,)
        in_specs = [
            pl.BlockSpec((tm, d_in), lambda i: (i, 0)),        # x rows (streamed)
            pl.BlockSpec((d_in, hidden), lambda i: (0, 0)),    # w1 (resident)
            pl.BlockSpec((1, hidden), lambda i: (0, 0)),       # b1 (resident)
            pl.BlockSpec((hidden, d_out), lambda i: (0, 0)),   # w2 (resident)
            pl.BlockSpec((1, d_out), lambda i: (0, 0)),        # b2 (resident)
        ]
        out_spec = pl.BlockSpec((tm, d_out), lambda i: (i, 0))
        scratch = []
        kernel = _make_resident_kernel(gelu_approximate)
        dims = ("parallel",)
        est = resident_est
    else:
        th = _pick_h_tile(hidden, tile_h)
        grid = (m_tiles, hidden // th)
        # NOTE: if this streaming path ever becomes DMA-exposed, consider
        # pipeline_mode=pl.Buffered(3) on the w1/w2 specs (sweep 2 vs 3).
        in_specs = [
            pl.BlockSpec((tm, d_in), lambda i, k: (i, 0)),     # x rows
            pl.BlockSpec((d_in, th), lambda i, k: (0, k)),     # w1 hidden tile
            pl.BlockSpec((1, th), lambda i, k: (0, k)),        # b1 hidden tile
            pl.BlockSpec((th, d_out), lambda i, k: (k, 0)),    # w2 hidden tile
            pl.BlockSpec((1, d_out), lambda i, k: (0, 0)),     # b2
        ]
        out_spec = pl.BlockSpec((tm, d_out), lambda i, k: (i, 0))
        scratch = [pltpu.VMEM((tm, d_out), jnp.float32)]
        kernel = _make_streaming_kernel(gelu_approximate)
        dims = ("parallel", "arbitrary")
        est = (2 * (tm * d_in * x_b + d_in * th * w_b + th * b_b
                    + th * d_out * w_b + d_out * b_b)
               + 2 * tm * d_out * o_b
               + tm * d_out * 4)

    # Generation-aware scoped-VMEM limit: ~2x headroom over the estimate,
    # clamped to ~90% of real per-core capacity (128 MiB v5e/v6e, 64 MiB v7x).
    vmem_limit = int(max(min(int(0.9 * vmem_cap), 2 * est),
                         32 * 1024 * 1024))

    out2d = pl.pallas_call(
        kernel,
        out_shape=jax.ShapeDtypeStruct((M, d_out), out_dtype),
        grid_spec=pltpu.PrefetchScalarGridSpec(
            num_scalar_prefetch=0,
            grid=grid,
            in_specs=in_specs,
            out_specs=out_spec,
            scratch_shapes=scratch,
        ),
        compiler_params=pltpu.CompilerParams(
            dimension_semantics=dims,
            vmem_limit_bytes=vmem_limit,
        ),
    )(x2d, w1, b1, w2, b2)

    return out2d.reshape(B, N, d_out)


# ----------------------------------------------------------------------------
# Params / reference
# ----------------------------------------------------------------------------
def init_mlp_params(key, in_features, hidden_features, out_features,
                    dtype=jnp.float32):
    """Synthetic init matching nn.Linear parameter shapes, stored (in, out)."""
    k1, k2, k3, k4 = jax.random.split(key, 4)
    lim1 = 1.0 / (in_features ** 0.5)
    lim2 = 1.0 / (hidden_features ** 0.5)
    w1 = jax.random.uniform(k1, (in_features, hidden_features), dtype, -lim1, lim1)
    b1 = jax.random.uniform(k2, (1, hidden_features), dtype, -lim1, lim1)
    w2 = jax.random.uniform(k3, (hidden_features, out_features), dtype, -lim2, lim2)
    b2 = jax.random.uniform(k4, (1, out_features), dtype, -lim2, lim2)
    return w1, b1, w2, b2


def mlp_reference(x, w1, b1, w2, b2):
    """Pure-JAX f32 reference (same semantics as the PyTorch module, drop=0)."""
    h = x @ w1 + b1[0]
    h = 0.5 * h * (1.0 + jax.lax.erf(h / jnp.sqrt(2.0)))
    return h @ w2 + b2[0]


if __name__ == "__main__":
    key = jax.random.PRNGKey(0)
    k1, k2, k3, k4, k5, k6 = jax.random.split(key, 6)

    # --- 1) small exact-f32 check (resident-weights path) --------------------
    B, N, d_in, hidden, d_out = 2, 8, 32, 64, 32
    x = jax.random.normal(k1, (B, N, d_in), dtype=jnp.float32)
    params = init_mlp_params(k2, d_in, hidden, d_out)

    out = jax.block_until_ready(mlp_forward(x, *params, compute_dtype=None))
    ref = mlp_reference(x, *params)
    assert out.shape == (B, N, d_out), out.shape
    assert jnp.allclose(out, ref, atol=1e-4, rtol=1e-4), \
        float(jnp.max(jnp.abs(out - ref)))

    # --- 2) bf16 MXU path, resident weights, multiple M tiles ----------------
    B2, N2, d_in2, hidden2, d_out2 = 2, 192, 128, 512, 256
    x2 = jax.random.normal(k3, (B2, N2, d_in2), dtype=jnp.float32)
    w1f, b1f, w2f, b2f = init_mlp_params(k4, d_in2, hidden2, d_out2)
    # weights pre-stored in bf16 -> in-jit casts are no-ops (review item)
    out2 = jax.block_until_ready(mlp_forward(
        x2, w1f.astype(jnp.bfloat16), b1f, w2f.astype(jnp.bfloat16), b2f,
        tile_m=128))
    ref2 = mlp_reference(x2, w1f, b1f, w2f, b2f)
    assert out2.shape == (B2, N2, d_out2), out2.shape
    assert jnp.allclose(out2, ref2, atol=5e-2, rtol=5e-2), \
        float(jnp.max(jnp.abs(out2 - ref2)))

    # --- 3) forced streaming path (hidden-reduction grid + f32 accumulator) --
    B3, N3, d_in3, hidden3, d_out3 = 2, 64, 128, 512, 128
    x3 = jax.random.normal(k5, (B3, N3, d_in3), dtype=jnp.float32)
    params3 = init_mlp_params(k6, d_in3, hidden3, d_out3)
    out3 = jax.block_until_ready(mlp_forward(
        x3, *params3, tile_m=128, tile_h=256, weights_resident=False))
    ref3 = mlp_reference(x3, *params3)
    assert out3.shape == (B3, N3, d_out3), out3.shape
    assert jnp.allclose(out3, ref3, atol=5e-2, rtol=5e-2), \
        float(jnp.max(jnp.abs(out3 - ref3)))

    print("KERNEL_OK")
</pallas_src>

<mosaic_0001>
module attributes {stable_mosaic.version = 11 : i64} {
  func.func @kernel(%arg0: i32, %arg1: memref<16x32xf32, #tpu.memory_space<vmem>>, %arg2: memref<32x64xf32, #tpu.memory_space<vmem>>, %arg3: memref<1x64xf32, #tpu.memory_space<vmem>>, %arg4: memref<64x32xf32, #tpu.memory_space<vmem>>, %arg5: memref<1x32xf32, #tpu.memory_space<vmem>>, %arg6: memref<16x32xf32, #tpu.memory_space<vmem>>) attributes {dimension_semantics = [#tpu.dimension_semantics<parallel>], iteration_bounds = array<i64: 1>, scalar_prefetch = 0 : i64, scratch_operands = 0 : i64, tpu.core_type = #tpu.core_type<tc>, window_params = [{transform_indices = @transform_0, window_bounds = array<i64: 16, 32>}, {pipeline_mode = #tpu.pipeline_mode<synchronous>, transform_indices = @transform_1, window_bounds = array<i64: 32, 64>}, {pipeline_mode = #tpu.pipeline_mode<synchronous>, transform_indices = @transform_2, window_bounds = array<i64: 1, 64>}, {pipeline_mode = #tpu.pipeline_mode<synchronous>, transform_indices = @transform_3, window_bounds = array<i64: 64, 32>}, {pipeline_mode = #tpu.pipeline_mode<synchronous>, transform_indices = @transform_4, window_bounds = array<i64: 1, 32>}, {transform_indices = @transform_5, window_bounds = array<i64: 16, 32>}]} {
    %c0 = arith.constant 0 : index
    %c0_0 = arith.constant 0 : index
    %0 = vector.load %arg1[%c0, %c0_0] : memref<16x32xf32, #tpu.memory_space<vmem>>, vector<16x32xf32>
    %c0_1 = arith.constant 0 : index
    %c0_2 = arith.constant 0 : index
    %1 = vector.load %arg2[%c0_1, %c0_2] : memref<32x64xf32, #tpu.memory_space<vmem>>, vector<32x64xf32>
    %cst = arith.constant dense<0.000000e+00> : vector<16x64xf32>
    %2 = tpu.matmul %0, %1, %cst {dimension_numbers = #tpu.dot_dimension_numbers<[1], [0], [0], [1], [0, 0, 1, 1], [], []>} : vector<16x32xf32>, vector<32x64xf32>, vector<16x64xf32> -> vector<16x64xf32>
    %c0_3 = arith.constant 0 : index
    %c0_4 = arith.constant 0 : index
    %3 = vector.load %arg3[%c0_3, %c0_4] : memref<1x64xf32, #tpu.memory_space<vmem>>, vector<1x64xf32>
    %4 = vector.broadcast %3 : vector<1x64xf32> to vector<16x64xf32>
    %5 = arith.addf %2, %4 : vector<16x64xf32>
    %cst_5 = arith.constant 5.000000e-01 : f32
    %6 = vector.broadcast %cst_5 : f32 to vector<16x64xf32>
    %7 = arith.mulf %6, %5 : vector<16x64xf32>
    %cst_6 = arith.constant 0.707106769 : f32
    %8 = vector.broadcast %cst_6 : f32 to vector<16x64xf32>
    %9 = arith.mulf %5, %8 : vector<16x64xf32>
    %10 = math.erf %9 : vector<16x64xf32>
    %cst_7 = arith.constant 1.000000e+00 : f32
    %11 = vector.broadcast %cst_7 : f32 to vector<16x64xf32>
    %12 = arith.addf %11, %10 : vector<16x64xf32>
    %13 = arith.mulf %7, %12 : vector<16x64xf32>
    %c0_8 = arith.constant 0 : index
    %c0_9 = arith.constant 0 : index
    %14 = vector.load %arg4[%c0_8, %c0_9] : memref<64x32xf32, #tpu.memory_space<vmem>>, vector<64x32xf32>
    %cst_10 = arith.constant dense<0.000000e+00> : vector<16x32xf32>
    %15 = tpu.matmul %13, %14, %cst_10 {dimension_numbers = #tpu.dot_dimension_numbers<[1], [0], [0], [1], [0, 0, 1, 1], [], []>} : vector<16x64xf32>, vector<64x32xf32>, vector<16x32xf32> -> vector<16x32xf32>
    %c0_11 = arith.constant 0 : index
    %c0_12 = arith.constant 0 : index
    %16 = vector.load %arg5[%c0_11, %c0_12] : memref<1x32xf32, #tpu.memory_space<vmem>>, vector<1x32xf32>
    %17 = vector.broadcast %16 : vector<1x32xf32> to vector<16x32xf32>
    %18 = arith.addf %15, %17 : vector<16x32xf32>
    %c0_13 = arith.constant 0 : index
    %c0_14 = arith.constant 0 : index
    %19 = vector.load %arg6[%c0_13, %c0_14] : memref<16x32xf32, #tpu.memory_space<vmem>>, vector<16x32xf32>
    tpu.vector_store %arg6[%c0_13, %c0_14], %18 {strides = array<i32>} : memref<16x32xf32, #tpu.memory_space<vmem>>, vector<16x32xf32>,
    return
  }
  func.func @transform_0(%arg0: i32) -> (i32, i32) {
    %c0_i32 = arith.constant 0 : i32
    %c0_i32_0 = arith.constant 0 : i32
    return %arg0, %c0_i32 : i32, i32
  }
  func.func @transform_1(%arg0: i32) -> (i32, i32) {
    %c0_i32 = arith.constant 0 : i32
    %c0_i32_0 = arith.constant 0 : i32
    %c0_i32_1 = arith.constant 0 : i32
    return %c0_i32, %c0_i32_0 : i32, i32
  }
  func.func @transform_2(%arg0: i32) -> (i32, i32) {
    %c0_i32 = arith.constant 0 : i32
    %c0_i32_0 = arith.constant 0 : i32
    %c0_i32_1 = arith.constant 0 : i32
    return %c0_i32, %c0_i32_0 : i32, i32
  }
  func.func @transform_3(%arg0: i32) -> (i32, i32) {
    %c0_i32 = arith.constant 0 : i32
    %c0_i32_0 = arith.constant 0 : i32
    %c0_i32_1 = arith.constant 0 : i32
    return %c0_i32, %c0_i32_0 : i32, i32
  }
  func.func @transform_4(%arg0: i32) -> (i32, i32) {
    %c0_i32 = arith.constant 0 : i32
    %c0_i32_0 = arith.constant 0 : i32
    %c0_i32_1 = arith.constant 0 : i32
    return %c0_i32, %c0_i32_0 : i32, i32
  }
  func.func @transform_5(%arg0: i32) -> (i32, i32) {
    %c0_i32 = arith.constant 0 : i32
    %c0_i32_0 = arith.constant 0 : i32
    return %arg0, %c0_i32 : i32, i32
  }
}

</mosaic_0001>

<bundles_post_ra>
// kernel: mlp_forward.1
= control target key start
LH: loop header
LB: loop body
LE: loop exit
PB: predicated region body
PF: predicated region fallthrough
CT: control target
= control target key end

     0   :  { %vm34_vm0 = vcmask 261120   ;;  %s410_s0 = inlined_call_operand.vmem [shape: f32[16,32], index: 0, kind: input, shape index: {}]   ;;  %s411_s1 = inlined_call_operand.vmem [shape: f32[32,64], index: 1, kind: input, shape index: {}]   ;;  %s412_s2 = inlined_call_operand.vmem [shape: f32[1,64], index: 2, kind: input, shape index: {}]   ;;  %s413_s3 = inlined_call_operand.vmem [shape: f32[64,32], index: 3, kind: input, shape index: {}]   ;;  %s414_s4 = inlined_call_operand.vmem [shape: f32[1,32], index: 4, kind: input, shape index: {}]   ;;  %s415_s5 = inlined_call_operand.hbm [shape: f32[16,32], index: 5, kind: output, shape index: {}]  }
   0x1   :  { %v26_v0 = vld [vmem:[%s411_s1 + $0x18] sm:$0xff]  ;;  %v25_v1 = vld [vmem:[%s411_s1 + $0x10] sm:$0xff]  ;;  %v21_v2 = vld [vmem:[%s410_s0] sm:$0xff] }
   0x2   :  { %263 = vmatprep.subr.mxu0 %v26_v0  ;;  %v24_v3 = vld [vmem:[%s411_s1 + $0x8] sm:$0xff]  ;;  %271 = vmatprep.mubr.msk.f32.mxu0 %vm34_vm0, %v21_v2 }
   0x3   :  { %264 = vmatpush3.msra.mxu0 %v26_v0 }
   0x4   :  { %10 = vsyncpa [#allocation3], 0  ;;  %265 = vmatprep.subr.mxu0 %v25_v1  ;;  %v23_v4 = vld [vmem:[%s411_s1] sm:$0xff]  ;;  %v22_v5 = vld [vmem:[%s410_s0 + $0x8] sm:$0xff]  ;;  %vm141_vm1 = vcmask 523264   ;;  %s322_s21 = smov [#allocation2]  }
   0x5   :  { %266 = vmatpush3.msra.mxu0 %v25_v1  ;;  %v133_v6 = vld [vmem:[%s413_s3 + $0x38] sm:$0xff]  ;;  %v132_v7 = vld [vmem:[%s413_s3 + $0x30] sm:$0xff]  ;;  %v131_v8 = vld [vmem:[%s413_s3 + $0x28] sm:$0xff]  ;;  %s230_s22 = sshll.u32 %s322_s21, 4  ;;  %s231_s22 = int_to_ptr.vmem [resolvable:$true] %s230_s22 }
   0x6   :  { %267 = vmatprep.subr.mxu0 %v24_v3  ;;  %274 = vmatprep.subr.mxu1 %v133_v6  ;;  %v130_v9 = vld [vmem:[%s413_s3 + $0x20] sm:$0xff]  ;;  %v129_v10 = vld [vmem:[%s413_s3 + $0x18] sm:$0xff]  ;;  %v128_v11 = vld [vmem:[%s413_s3 + $0x10] sm:$0xff]  ;;  %s300_s23 = scalar_lea.vmem %s231_s22, 256  ;;  %p305_p1 = scmp.lt.s32.totalorder %s231_s22, %s231_s22 }
   0x7   :  { %268 = vmatpush3.msra.mxu0 %v24_v3  ;;  %275 = vmatpush3.msra.mxu1 %v133_v6  ;;  %v127_v12 = vld [vmem:[%s413_s3 + $0x8] sm:$0xff]  ;;  %v126_v13 = vld [vmem:[%s413_s3] sm:$0xff]  ;;  %p301_p0 = scmp.ne.s32.totalorder %s231_s22, %s300_s23  ;;  %p306_p2 = scmp.lt.s32.totalorder %s300_s23, %s300_s23 }
   0x8   :  { %269 = vmatprep.subr.mxu0 %v23_v4  ;;  %276 = vmatprep.subr.mxu1 %v132_v7  ;;  %v241_v14 = vld [vmem:[%s412_s2] ss:$0 sm:$0xff] }
   0x9   :  { %270 = vmatpush3.msra.mxu0 %v23_v4  ;;  %277 = vmatpush3.msra.mxu1 %v132_v7  ;;  %v244_v29 = vld [vmem:[%s414_s4] ss:$0 sm:$0xff]  ;;  %p307_p3 = por %p306_p2, %p305_p1 }
   0xa   :  { %272 = vmatmul.mubr.msk.f32.vlgmr.msra.gmra.mxu0 %vm34_vm0, %v22_v5  ;;  %278 = vmatprep.subr.mxu1 %v131_v8 }
   0xb   :  { %279 = vmatpush3.msra.mxu1 %v131_v8  ;;  %p308_p4 = pnand %p307_p3, %p301_p0 }
   0xc   :  { %280 = vmatprep.subr.mxu1 %v130_v9 }
   0xd   :  { %281 = vmatpush3.msra.mxu1 %v130_v9 }
   0xe   :  { %282 = vmatprep.subr.mxu1 %v129_v10 }
   0xf   :  { %283 = vmatpush3.msra.mxu1 %v129_v10 }
  0x10   :  { %284 = vmatprep.subr.mxu1 %v128_v11 }
  0x11   :  { %285 = vmatpush3.msra.mxu1 %v128_v11 }
  0x12   :  { %286 = vmatprep.subr.mxu1 %v127_v12 }
  0x13   :  { %287 = vmatpush3.msra.mxu1 %v127_v12 }
  0x14   :  { %288 = vmatprep.subr.mxu1 %v126_v13 }
  0x15   :  { %289 = vmatpush3.msra.mxu1 %v126_v13 }
  0xca   :  { %v273_v15 = vpop.f32.mrf.mxu0 }
  0xcb   :  { %v113_v16 = vadd.f32 %v273_v15, %v241_v14 }
  0xcc   :  { %v107_v17 = vpop.f32.mrf.mxu0 }
  0xcd   :  { %v119_v18 = vmul.f32 0.70710677, %v113_v16  ;;  %v108_v19 = vadd.f32 %v241_v14, %v107_v17  ;;  %v117_v26 = vmul.f32 0.5, %v113_v16 }
  0xcf   :  { %296 = verf.f32 %v119_v18  ;;  %v118_v20 = vmul.f32 0.70710677, %v108_v19  ;;  %v116_v24 = vmul.f32 0.5, %v108_v19 }
  0xd1   :  { %298 = verf.f32 %v118_v20 }
  0xdc   :  { %v297_v21 = vpop.eup %296 }
  0xdd   :  { %v123_v23 = vadd.f32 1.0, %v297_v21 }
  0xde   :  { %v299_v22 = vpop.eup %298 }
  0xdf   :  { %v122_v25 = vadd.f32 1.0, %v299_v22  ;;  %v125_v28 = vmul.f32 %v123_v23, %v117_v26 }
  0xe1   :  { %v124_v27 = vmul.f32 %v122_v25, %v116_v24 }
  0xe3   :  { %290 = vmatprep.mubr.msk.f32.mxu1 %vm141_vm1, %v124_v27 }
  0xe4   :  { %291 = vmatmul.mubr.msk.f32.vlgmr.msra.gmra.mxu1 %vm141_vm1, %v125_v28 }
 0x1a4   :  { %v292_v30 = vpop.f32.mrf.mxu1 }
 0x1a5   :  { %v220_v31 = vadd.f32 %v292_v30, %v244_v29 }
 0x1a6   :  { %v214_v32 = vpop.f32.mrf.mxu1 }
 0x1a7   :  { %224 = vst.msk [vmem:[#allocation2 + $0x8] sm:$0xff] %vm34_vm0, %v220_v31  ;;  %v215_v33 = vadd.f32 %v244_v29, %v214_v32 }
 0x1a9   :  { %223 = vst.msk [vmem:[#allocation2] sm:$0xff] %vm34_vm0, %v215_v33 }
 0x1aa   :  { %311 = shalt.err (!%p308_p4)
}
 0x1ab   :  { %s323_s24 = smov 128   ;;  %s324_s4 = smov 8  }
 0x1ac   :  { %236 = dma.vmem_to_hbm [thread:$0]  %s231_s22, 256, %s415_s5, [#allocation3], %s323_s24, %s323_s24, %s324_s4  }
 0x1ad   :  { %320 = dma.done.wait [#allocation3], 256  }
 0x1ae   :  { %321 = vsyncadd [#allocation3], 4294967040 }
 0x1af   :  { %240 = vsyncpa [#allocation3], 1 }

</bundles_post_ra>
